<compile_context>
chip_gen: v6e
topology: v6e:2x2x1
jax: 0.10.0
libtpu: 0.0.40
codegen_flags: <defaults>
</compile_context>

<pallas_src>
import functools

import jax
import jax.numpy as jnp
from jax import lax
from jax.experimental import pallas as pl
from jax.experimental.pallas import tpu as pltpu


def _round_up(x, m):
    return ((x + m - 1) // m) * m


def _make_kernel(margin, max_violation, n_valid, tm, ncols):
    """Builds the row-block kernel. All arguments are trace-time constants."""
    padded = ncols != n_valid  # rows/cols beyond n_valid are zero padding

    def kernel(scores_ref, diag_row_ref, diag_col_ref, out_ref, *scratch):
        i = pl.program_id(0)
        last = pl.num_programs(0) - 1

        @pl.when(i == 0)
        def _init():
            out_ref[0, 0] = 0.0
            if max_violation:
                scratch[0][...] = jnp.zeros_like(scratch[0])

        i0 = i * tm
        blk = scores_ref[...].astype(jnp.float32)                 # (tm, ncols)

        row_g = lax.broadcasted_iota(jnp.int32, (tm, ncols), 0) + i0
        col_g = lax.broadcasted_iota(jnp.int32, (tm, ncols), 1)
        keep = row_g != col_g                                     # mask the diagonal
        if padded:
            # mask the zero padding so it never contributes to sums / maxes
            keep = keep & (row_g < n_valid) & (col_g < n_valid)

        diag_i = diag_col_ref[...].astype(jnp.float32)            # (tm, 1): diag of block rows
        diag_j = diag_row_ref[...].astype(jnp.float32)            # (1, ncols): full diagonal

        # hinge costs for this row block, diagonal (and padding) forced to 0
        cost_s = jnp.where(keep, jnp.maximum(margin + blk - diag_i, 0.0), 0.0)
        cost_im = jnp.where(keep, jnp.maximum(margin + blk - diag_j, 0.0), 0.0)

        if max_violation:
            # hardest negatives: row maxes are final for this block, column
            # maxes accumulate across blocks in VMEM scratch.
            out_ref[0, 0] += jnp.sum(jnp.max(cost_s, axis=1, keepdims=True))
            cmax = scratch[0]
            cmax[...] = jnp.maximum(cmax[...],
                                    jnp.max(cost_im, axis=0, keepdims=True))

            @pl.when(i == last)
            def _finalize():
                # all entries are >= 0 (diag contributes an explicit 0), so the
                # zero-initialized running max is exact; padded cols stay 0.
                out_ref[0, 0] += jnp.sum(cmax[...])
        else:
            out_ref[0, 0] += jnp.sum(cost_s) + jnp.sum(cost_im)

    return kernel


def triplet_loss(scores, margin=0.0, max_violation=False, block_rows=128):
    """Pallas equivalent of TripletLoss(margin, max_violation).forward(scores)."""
    n = scores.shape[0]
    assert scores.ndim == 2 and scores.shape[1] == n, "scores must be (N, N)"

    # Row-block size: lane/sublane friendly, capped by N for tiny inputs.
    tm = min(block_rows, _round_up(n, 8))
    np_ = _round_up(n, tm)                       # padded square size
    if np_ != n:
        scores_p = jnp.pad(scores, ((0, np_ - n), (0, np_ - n)))
    else:
        scores_p = scores

    # Diagonal extracted once (O(N) read), passed in both layouts; kernel casts
    # to f32 internally, so inputs keep their native dtype (no wrapper cast).
    d = jnp.diagonal(scores_p)
    diag_row = d.reshape(1, np_)
    diag_col = d.reshape(np_, 1)

    grid = (np_ // tm,)
    kernel = _make_kernel(float(margin), bool(max_violation), n, tm, np_)
    scratch = [pltpu.VMEM((1, np_), jnp.float32)] if max_violation else []

    itemsize = jnp.dtype(scores_p.dtype).itemsize
    # rough VMEM budget: 2x double-buffered score blocks + ~8 f32 block temps
    vmem_need = 4 * tm * np_ * itemsize + 8 * tm * np_ * 4 + 4 * np_ * 8
    vmem_limit = int(min(48 * 2 ** 20, max(32 * 2 ** 20, vmem_need)))

    out = pl.pallas_call(
        kernel,
        out_shape=jax.ShapeDtypeStruct((1, 1), jnp.float32),
        grid_spec=pltpu.PrefetchScalarGridSpec(
            num_scalar_prefetch=0,
            grid=grid,
            in_specs=[
                pl.BlockSpec((tm, np_), lambda i: (i, 0)),   # streamed row block
                pl.BlockSpec((1, np_), lambda i: (0, 0)),    # full diagonal (row)
                pl.BlockSpec((tm, 1), lambda i: (i, 0)),     # block diagonal (col)
            ],
            out_specs=pl.BlockSpec((1, 1), lambda i: (0, 0),
                                   memory_space=pltpu.MemorySpace.SMEM),
            scratch_shapes=scratch,
        ),
        compiler_params=pltpu.CompilerParams(
            dimension_semantics=("arbitrary",),
            vmem_limit_bytes=vmem_limit,
        ),
        cost_estimate=pl.CostEstimate(
            flops=10 * n * n,
            transcendentals=0,
            bytes_accessed=np_ * np_ * itemsize + 2 * np_ * itemsize + 4,
        ),
    )(scores_p, diag_row, diag_col)
    return out[0, 0]


def _reference(scores, margin=0.0, max_violation=False):
    """Pure-JAX mirror of the PyTorch forward, for correctness checking."""
    n = scores.shape[0]
    diag = jnp.diag(scores).reshape(n, 1)
    eye = jnp.eye(n, dtype=bool)
    cost_s = jnp.where(eye, 0.0, jnp.maximum(margin + scores - diag, 0.0))
    cost_im = jnp.where(eye, 0.0, jnp.maximum(margin + scores - diag.T, 0.0))
    if max_violation:
        return cost_s.max(axis=1).sum() + cost_im.max(axis=0).sum()
    return cost_s.sum() + cost_im.sum()


if __name__ == "__main__":
    # Small deterministic example: N image/caption pairs with D-dim embeddings.
    # N=200 is not a multiple of the 128-row block, exercising padding/masking
    # and a 2-step accumulation grid.
    N, D = 200, 32
    key = jax.random.PRNGKey(0)
    k_im, k_s = jax.random.split(key)
    im = jax.random.normal(k_im, (N, D), dtype=jnp.float32)
    st = jax.random.normal(k_s, (N, D), dtype=jnp.float32)
    im = im / jnp.linalg.norm(im, axis=1, keepdims=True)
    st = st / jnp.linalg.norm(st, axis=1, keepdims=True)
    scores = im @ st.T                                            # (N, N)

    for margin, max_violation in [(0.0, False), (0.2, False), (0.2, True)]:
        got = jax.block_until_ready(triplet_loss(scores, margin, max_violation))
        ref = jax.block_until_ready(_reference(scores, margin, max_violation))
        assert jnp.allclose(got, ref, rtol=1e-4, atol=1e-2), (
            margin, max_violation, got, ref)

    print("KERNEL_OK")
</pallas_src>

<mosaic_0001>
module attributes {stable_mosaic.version = 11 : i64} {
  func.func @kernel(%arg0: i32, %arg1: memref<128x256xf32, #tpu.memory_space<vmem>>, %arg2: memref<1x256xf32, #tpu.memory_space<vmem>>, %arg3: memref<128x1xf32, #tpu.memory_space<vmem>>, %arg4: memref<1x1xf32, #tpu.memory_space<smem>>) attributes {dimension_semantics = [#tpu.dimension_semantics<arbitrary>], iteration_bounds = array<i64: 2>, scalar_prefetch = 0 : i64, scratch_operands = 0 : i64, tpu.core_type = #tpu.core_type<tc>, window_params = [{transform_indices = @transform_0, window_bounds = array<i64: 128, 256>}, {pipeline_mode = #tpu.pipeline_mode<synchronous>, transform_indices = @transform_1, window_bounds = array<i64: 1, 256>}, {transform_indices = @transform_2, window_bounds = array<i64: 128, 1>}, {transform_indices = @transform_3, window_bounds = array<i64: 1, 1>}]} {
    %c0_i32 = arith.constant 0 : i32
    %0 = arith.cmpi eq, %arg0, %c0_i32 : i32
    %1 = arith.extui %0 : i1 to i32
    %c0_i32_0 = arith.constant 0 : i32
    %2 = arith.cmpi ne, %1, %c0_i32_0 : i32
    scf.if %2 {
      %cst_18 = arith.constant 0.000000e+00 : f32
      %c0_19 = arith.constant 0 : index
      %c0_20 = arith.constant 0 : index
      %46 = memref.load %arg4[%c0_19, %c0_20] : memref<1x1xf32, #tpu.memory_space<smem>>
      memref.store %cst_18, %arg4[%c0_19, %c0_20] : memref<1x1xf32, #tpu.memory_space<smem>>
    } else {
    }
    %c128_i32 = arith.constant 128 : i32
    %3 = arith.muli %arg0, %c128_i32 : i32
    %c0 = arith.constant 0 : index
    %c0_1 = arith.constant 0 : index
    %4 = vector.load %arg1[%c0, %c0_1] : memref<128x256xf32, #tpu.memory_space<vmem>>, vector<128x256xf32>
    %5 = tpu.iota {dimensions = array<i32: 0>} : vector<128x256xi32>
    %6 = vector.broadcast %3 : i32 to vector<128x256xi32>
    %7 = arith.addi %5, %6 : vector<128x256xi32>
    %8 = tpu.iota {dimensions = array<i32: 1>} : vector<128x256xi32>
    %9 = arith.cmpi ne, %7, %8 : vector<128x256xi32>
    %c200_i32 = arith.constant 200 : i32
    %10 = vector.broadcast %c200_i32 : i32 to vector<128x256xi32>
    %11 = arith.cmpi slt, %7, %10 : vector<128x256xi32>
    %12 = arith.andi %9, %11 : vector<128x256xi1>
    %c200_i32_2 = arith.constant 200 : i32
    %13 = vector.broadcast %c200_i32_2 : i32 to vector<128x256xi32>
    %14 = arith.cmpi slt, %8, %13 : vector<128x256xi32>
    %15 = arith.andi %12, %14 : vector<128x256xi1>
    %c0_3 = arith.constant 0 : index
    %c0_4 = arith.constant 0 : index
    %16 = vector.load %arg3[%c0_3, %c0_4] : memref<128x1xf32, #tpu.memory_space<vmem>>, vector<128x1xf32>
    %c0_5 = arith.constant 0 : index
    %c0_6 = arith.constant 0 : index
    %17 = vector.load %arg2[%c0_5, %c0_6] : memref<1x256xf32, #tpu.memory_space<vmem>>, vector<1x256xf32>
    %cst = arith.constant 0.000000e+00 : f32
    %18 = vector.broadcast %cst : f32 to vector<128x256xf32>
    %19 = arith.addf %18, %4 : vector<128x256xf32>
    %20 = vector.broadcast %16 : vector<128x1xf32> to vector<128x256xf32>
    %21 = arith.subf %19, %20 : vector<128x256xf32>
    %cst_7 = arith.constant 0.000000e+00 : f32
    %22 = vector.broadcast %cst_7 : f32 to vector<128x256xf32>
    %23 = arith.maximumf %21, %22 : vector<128x256xf32>
    %cst_8 = arith.constant 0.000000e+00 : f32
    %24 = vector.broadcast %cst_8 : f32 to vector<128x256xf32>
    %25 = arith.select %15, %23, %24 : vector<128x256xi1>, vector<128x256xf32>
    %cst_9 = arith.constant 0.000000e+00 : f32
    %26 = vector.broadcast %cst_9 : f32 to vector<128x256xf32>
    %27 = arith.addf %26, %4 : vector<128x256xf32>
    %28 = vector.broadcast %17 : vector<1x256xf32> to vector<128x256xf32>
    %29 = arith.subf %27, %28 : vector<128x256xf32>
    %cst_10 = arith.constant 0.000000e+00 : f32
    %30 = vector.broadcast %cst_10 : f32 to vector<128x256xf32>
    %31 = arith.maximumf %29, %30 : vector<128x256xf32>
    %cst_11 = arith.constant 0.000000e+00 : f32
    %32 = vector.broadcast %cst_11 : f32 to vector<128x256xf32>
    %33 = arith.select %15, %31, %32 : vector<128x256xi1>, vector<128x256xf32>
    %c0_12 = arith.constant 0 : index
    %c0_13 = arith.constant 0 : index
    %34 = memref.load %arg4[%c0_12, %c0_13] : memref<1x1xf32, #tpu.memory_space<smem>>
    %35 = vector.shape_cast %25 : vector<128x256xf32> to vector<1x128x256xf32>
    %cst_14 = arith.constant dense<0.000000e+00> : vector<1xf32>
    %36 = vector.multi_reduction <add>, %35, %cst_14 [1, 2] : vector<1x128x256xf32> to vector<1xf32>
    %37 = vector.shape_cast %36 : vector<1xf32> to vector<1x1x1xf32>
    %38 = vector.extract %37[0, 0, 0] : f32 from vector<1x1x1xf32>
    %39 = vector.shape_cast %33 : vector<128x256xf32> to vector<1x128x256xf32>
    %cst_15 = arith.constant dense<0.000000e+00> : vector<1xf32>
    %40 = vector.multi_reduction <add>, %39, %cst_15 [1, 2] : vector<1x128x256xf32> to vector<1xf32>
    %41 = vector.shape_cast %40 : vector<1xf32> to vector<1x1x1xf32>
    %42 = vector.extract %41[0, 0, 0] : f32 from vector<1x1x1xf32>
    %43 = arith.addf %38, %42 : f32
    %44 = arith.addf %34, %43 : f32
    %c0_16 = arith.constant 0 : index
    %c0_17 = arith.constant 0 : index
    %45 = memref.load %arg4[%c0_16, %c0_17] : memref<1x1xf32, #tpu.memory_space<smem>>
    memref.store %44, %arg4[%c0_16, %c0_17] : memref<1x1xf32, #tpu.memory_space<smem>>
    return
  }
  func.func @transform_0(%arg0: i32) -> (i32, i32) {
    %c0_i32 = arith.constant 0 : i32
    %c0_i32_0 = arith.constant 0 : i32
    return %arg0, %c0_i32 : i32, i32
  }
  func.func @transform_1(%arg0: i32) -> (i32, i32) {
    %c0_i32 = arith.constant 0 : i32
    %c0_i32_0 = arith.constant 0 : i32
    %c0_i32_1 = arith.constant 0 : i32
    return %c0_i32, %c0_i32_0 : i32, i32
  }
  func.func @transform_2(%arg0: i32) -> (i32, i32) {
    %c0_i32 = arith.constant 0 : i32
    %c0_i32_0 = arith.constant 0 : i32
    return %arg0, %c0_i32 : i32, i32
  }
  func.func @transform_3(%arg0: i32) -> (i32, i32) {
    %c0_i32 = arith.constant 0 : i32
    %c0_i32_0 = arith.constant 0 : i32
    %c0_i32_1 = arith.constant 0 : i32
    return %c0_i32, %c0_i32_0 : i32, i32
  }
}

</mosaic_0001>

<bundles_post_ra>
// kernel: tpu_custom_call.1
= control target key start
LH: loop header
LB: loop body
LE: loop exit
PB: predicated region body
PF: predicated region fallthrough
CT: control target
= control target key end

     0   :  { %8 = vsyncpa [#allocation3], 0  ;;  %s1834_s0 = inlined_call_operand.hbm [shape: f32[256,256], index: 0, kind: input, shape index: {}]   ;;  %s1835_s1 = inlined_call_operand.vmem [shape: f32[1,256], index: 1, kind: input, shape index: {}]   ;;  %s1836_s2 = inlined_call_operand.vmem [shape: f32[256,1], index: 2, kind: input, shape index: {}]   ;;  %s1837_s3 = inlined_call_operand.hbm [shape: f32[1,1], index: 3, kind: output, shape index: {}]  }
   0x1   :  { %10 = vsyncpa [#allocation3 + $0x1], 0 }
   0x2   :  { %11 = vsyncpa [#allocation4], 0  ;;  %s1058_s12 = smov 0   ;;  %s1060_s13 = smov 0  }
   0x3   :  { %s1062_s14 = smov 0   ;;  %s1064_s15 = smov 0  }
   0x4 LB: > { %s1077_s16 = sadd.s32 4294967295, %s1030_s15   ;;  %s1080_s17 = sadd.s32 1, %s1030_s15   ;;  %s1030_s15 = sphi %s1064_s15, %s2028_s15   ;;  %s1026_s14 = sphi %s1062_s14, %s2027_s14   ;;  %s1022_s13 = sphi %s1060_s13, %s2026_s13   ;;  %s1018_s12 = sphi %s1058_s12, %s2025_s12  }
   0x5   : > { %s21_s18 = ssub.s32 %s1030_s15, %s1080_s17  ;;  %s24_s19 = sadd.s32 1, %s1026_s14 }
   0x6   : > { %p22_p0 = scmp.eq.s32.totalorder %s21_s18, 0  ;;  %p31_p1 = scmp.ne.s32.totalorder %s1026_s14, %s1022_s13 }
   0x7   : > { %p32_p2 = scmp.eq.s32.totalorder %s1030_s15, 0  ;;  %p37_p3 = scmp.ne.s32.totalorder %s1022_s13, %s1018_s12 }
   0x8   : > { %s1090_s20 = scalar_select %p22_p0, %s1026_s14, %s24_s19  }
   0x9   : > { %p33_p4 = por %p32_p2, %p31_p1  ;;  %p1838_p5 = scmp.eq.s32.totalorder %s1077_s16, 0 }
   0xa   : > { %p911_p6 = scmp.lt.s32.totalorder %s1030_s15, 2  ;;  %s132_s22 = sand.u32 1, %s1026_s14  }
   0xb   : > { %p1096_p7 = por %p1838_p5, %p37_p3  ;;  %s879_s23 = sshll.u32 %s132_s22, 8 }
   0xc   : > { %s894_s24 = sshll.u32 %s1030_s15, 12  ;;  %s136_s28 = scalar_lea.vmem [#allocation2], %s879_s23 }
   0xd   : > { %s1879_s21 = scalar_select %p1096_p7, 1, 0 }
   0xe   : > { %s1105_s27 = scalar_lea.hbm %s1834_s0, %s894_s24  ;;  %s144_s29 = sshll.u32 %s136_s28, 4  ;;  %s1107_s29 = int_to_ptr.vmem [resolvable:$true] %s144_s29 }
   0xf   : > { %p1109_p8 = pnand %p911_p6, %p33_p4  ;;  %s1114_s4 = scalar_lea.sflag [#allocation3], %s132_s22 }
  0x10   : > { %s954_s5 = scalar_lea.hbm %s1105_s27, 4096  ;;  %s959_s8 = scalar_lea.hbm %s1834_s0, 8192 }
  0x11   : > { %p955_p10 = scmp.ne.s32.totalorder %s1105_s27, %s954_s5  ;;  %p956_p11 = pneg %p1109_p8 }
  0x12   : > { %p960_p0 = scmp.lt.s32.totalorder %s1105_s27, %s1834_s0  ;;  %p961_p1 = scmp.lt.s32.totalorder %s959_s8, %s954_s5 }
  0x13   : > { %p957_p12 = pnand %p956_p11, %p955_p10 }
  0x14   : > { %p962_p2 = por %p961_p1, %p960_p0 }
  0x15   : > { %p958_p13 = pneg %p957_p12 }
  0x17   : > { %p963_p3 = pnand %p962_p2, %p958_p13 }
  0x19   : > { %966 = shalt.err (!%p963_p3)
}
  0x1a   : > { %s967_s11 = scalar_lea.vmem %s1107_s29, 4096  ;;  %s1032_s12 = smov [#allocation2]  }
  0x1b   : > { %p968_p4 = scmp.ne.s32.totalorder %s1107_s29, %s967_s11  ;;  %s972_s18 = sshll.u32 %s1032_s12, 4  ;;  %s973_s18 = int_to_ptr.vmem [resolvable:$false] %s972_s18 }
  0x1c   : > { %s974_s19 = scalar_lea.vmem %s973_s18, 8192  ;;  %p975_p12 = scmp.lt.s32.totalorder %s1107_s29, %s973_s18 }
  0x1d   : > { %p970_p6 = pnand %p968_p4, %p956_p11  ;;  %p976_p5 = scmp.lt.s32.totalorder %s974_s19, %s967_s11 }
  0x1f   : > { %p971_p10 = pneg %p970_p6  ;;  %p977_p9 = por %p976_p5, %p975_p12 }
  0x21   : > { %p978_p7 = pnand %p977_p9, %p971_p10 }
  0x23   : > { %981 = shalt.err (!%p978_p7)
}
  0x24   : > { %s1033_s22 = smov 256   ;;  %s1034_s23 = smov 16  }
  0x25   : > { %910 = dma.hbm_to_vmem [thread:$0]  (!%p1109_p8), %s1105_s27, 4096, %s1107_s29, %s1114_s4, %s1033_s22, %s1033_s22, %s1034_s23  }
  0x26   : > { %p161_p11 = scmp.lt.s32.totalorder %s1030_s15, 3  ;;  %p1881_p13 = scmp.ge.s32.totalorder %s1030_s15, 1 }
  0x28   : > { %p162_p0 = pnand %p1881_p13, %p161_p11 }
  0x2a   : > { %165 = sbr.rel (%p162_p0) target bundleno = 461 (0x1cd), region = 32 }
  0x2f   : > { %s167_s24 = sand.u32 1, %s1022_s13   ;;  %p1882_p5 = scmp.ne.s32.totalorder %s1879_s21, 0 }
  0x30   : > { %s884_s25 = sshll.u32 %s167_s24, 8  ;;  %s168_s26 = scalar_lea.sflag [#allocation3], %s167_s24 }
  0x31   : > { %s1139_s28 = scalar_lea.vmem [#allocation2], %s884_s25 }
  0x32   : > { %1009 = dma.done.wait (%p1882_p5), %s168_s26, 4096  }
  0x33   : > { %1011 = vsyncadd (%p1882_p5), %s168_s26, 4294963200  ;;  %s885_s30 = sshll.u32 %s1077_s16, 4  ;;  %v240_v0 = vlaneseq  ;;  %v1035_v1 = vmov 0   ;;  %s888_s15 = sshll.u32 %s1077_s16, 7  ;;  %v407_v16 = vld [vmem:[%s1835_s1] sm:$0x3] }
  0x34   : > { %953 = vset.pattern.permute.xlu1 %v1035_v1  ;;  %952 = vset.pattern.permute.xlu0 %v1035_v1  ;;  %p196_p7 = scmp.lt.s32.totalorder %s885_s30, 31  ;;  %v1150_v4 = vstv %s888_s15  ;;  %v1185_v22 = vld [vmem:[%s1139_s28 + $0x20] sm:$0xff]  ;;  %v1201_v26 = vld [vmem:[%s1139_s28 + $0x8] sm:$0xff]  ;;  %v1218_v31 = vld [vmem:[%s1139_s28 + $0x30] sm:$0xff]  ;;  %s1036_s7 = smov 0.0  }
  0x35   : > { %v1147_v2 = vshrl.u32 %v240_v0, 7  ;;  %v1152_v5 = vand.u32 127, %v240_v0  ;;  %v1198_v25 = vld [vmem:[%s1139_s28] sm:$0xff]  ;;  %v1204_v27 = vld [vmem:[%s1139_s28 + $0x28] sm:$0xff]  ;;  %v1228_v33 = vld [vmem:[%s1139_s28 + $0x10] sm:$0xff]  ;;  %p2024_p8 = scmp.eq.s32.totalorder %s1077_s16, 0 }
  0x36   : > { %s2030_s30 = smov (!%p196_p7, %s885_s30), 31  ;;  %v1231_v34 = vld [vmem:[%s1139_s28 + $0x18] sm:$0xff]  ;;  %v1301_v1 = vld [vmem:[%s1139_s28 + $0x40] sm:$0xff]  ;;  %v1336_v24 = vld [vmem:[%s1139_s28 + $0x50] sm:$0xff]  ;;  %p913_p9 = scmp.eq.s32.totalorder %s1077_s16, 1 }
  0x37   : > { %v243_v3 = vadd.s32 16, %v1147_v2  ;;  %s886_s27 = sshll.u32 %s2030_s30, 3  ;;  %v258_v9 = vadd.s32 %v1150_v4, %v1147_v2  ;;  %v242_v10 = vadd.s32 8, %v1147_v2  ;;  %v1168_v13 = vadd.s32 128, %v1152_v5  ;;  %v1261_v47 = vld [vmem:[%s1139_s28 + $0x38] sm:$0xff]  ;;  %902 = sst [smem:[#allocation5]] (%p2024_p8), %s1036_s7 }
  0x38   : > { %s1157_s4 = scalar_lea.vmem %s1836_s2, %s886_s27  ;;  %v619_v14 = vsub.s32 0, %v1147_v2  ;;  %v623_v15 = vsub.s32 1, %v1147_v2  ;;  %v244_v23 = vadd.s32 24, %v1147_v2  ;;  %v245_v49 = vadd.s32 32, %v1147_v2  ;;  %s723_s8 = sld [smem:[#allocation5]] }
  0x39   : > { %v393_v6 = vld [vmem:[%s1157_s4 + $0x10] sm:$0xff]  ;;  %v391_v7 = vld [vmem:[%s1157_s4] sm:$0xff]  ;;  %v260_v8 = vadd.s32 %v1150_v4, %v243_v3  ;;  %v394_v11 = vld [vmem:[%s1157_s4 + $0x18] sm:$0xff]  ;;  %vm277_vm2 = vcmp.ne.s32.totalorder %v258_v9, %v1152_v5  ;;  %vm309_vm3 = vcmp.lt.s32.totalorder %v258_v9, 200  ;;  %v259_v17 = vadd.s32 %v1150_v4, %v242_v10  ;;  %s1037_s18 = smov [#allocation5]  }
  0x3a   : > { %452 = vperm.xlu1 %953, %v393_v6   ;;  %442 = vperm.xlu0 %952, %v391_v7   ;;  %v392_v12 = vld [vmem:[%s1157_s4 + $0x8] sm:$0xff]  ;;  %v395_v19 = vld [vmem:[%s1157_s4 + $0x20] sm:$0xff]  ;;  %v1180_v20 = vrot.slane %v407_v16, %v619_v14  ;;  %v1182_v21 = vrot.slane %v407_v16, %v623_v15  ;;  %vm278_vm4 = vcmp.ne.s32.totalorder %v258_v9, %v1168_v13  ;;  %vm1840_vm6 = vcmp.lt.s32.totalorder %v1168_v13, 200  ;;  %vm1209_vm7 = vmand %vm277_vm2, %vm309_vm3 }
  0x3b   : > { %vm282_vm0 = vcmp.ne.s32.totalorder %v260_v8, %v1168_v13  ;;  %vm311_vm1 = vcmp.lt.s32.totalorder %v260_v8, 200  ;;  %v396_v18 = vld [vmem:[%s1157_s4 + $0x28] sm:$0xff]  ;;  %vm281_vm8 = vcmp.ne.s32.totalorder %v260_v8, %v1152_v5  ;;  %vm326_vm9 = vmand %vm278_vm4, %vm309_vm3  ;;  %vm279_vm10 = vcmp.ne.s32.totalorder %v259_v17, %v1152_v5  ;;  %v398_v35 = vld [vmem:[%s1157_s4 + $0x38] sm:$0xff] }
  0x3c   : > { %vm1192_vm5 = vmand %vm282_vm0, %vm311_vm1  ;;  %v627_v29 = vsub.f32 %v1198_v25, %v1180_v20  ;;  %v628_v30 = vsub.f32 %v1201_v26, %v1182_v21  ;;  %v631_v32 = vsub.f32 %v1185_v22, %v1180_v20  ;;  %v397_v36 = vld [vmem:[%s1157_s4 + $0x30] sm:$0xff]  ;;  %v261_v40 = vadd.s32 %v1150_v4, %v244_v23  ;;  %v400_v55 = vld [vmem:[%s1157_s4 + $0x48] sm:$0xff] }
  0x3d   : > { %vm1237_vm11 = vmand %vm326_vm9, %vm1840_vm6  ;;  %vm280_vm12 = vcmp.ne.s32.totalorder %v259_v17, %v1168_v13  ;;  %v632_v41 = vsub.f32 %v1204_v27, %v1182_v21  ;;  %vm310_vm13 = vcmp.lt.s32.totalorder %v259_v17, 200  ;;  %v629_v42 = vsub.f32 %v1228_v33, %v1180_v20  ;;  %v399_v56 = vld [vmem:[%s1157_s4 + $0x40] sm:$0xff]  ;;  %v402_v3 = vld [vmem:[%s1157_s4 + $0x58] sm:$0xff] }
  0x3e   : > { %457 = vperm.xlu1 %953, %v394_v11   ;;  %447 = vperm.xlu0 %952, %v392_v12   ;;  %v659_v38 = vmax.f32 %v627_v29, 0.0  ;;  %v660_v39 = vmax.f32 %v628_v30, 0.0  ;;  %v630_v43 = vsub.f32 %v1231_v34, %v1182_v21  ;;  %vm1252_vm14 = vmand %vm281_vm8, %vm311_vm1  ;;  %v633_v48 = vsub.f32 %v1218_v31, %v1180_v20  ;;  %v401_v10 = vld [vmem:[%s1157_s4 + $0x50] sm:$0xff]  ;;  %v1322_v14 = vld [vmem:[%s1139_s28 + $0x48] sm:$0xff] }
  0x3f   : > { %vm1270_vm15 = vmand %vm1192_vm5, %vm1840_vm6  ;;  %v663_v51 = vmax.f32 %v631_v32, 0.0  ;;  %v661_v53 = vmax.f32 %v629_v42, 0.0  ;;  %vm284_vm0 = vcmp.ne.s32.totalorder %v261_v40, %v1168_v13  ;;  %vm312_vm1 = vcmp.lt.s32.totalorder %v261_v40, 200 }
  0x40   : > { %v691_v45 = vsel %vm1209_vm7, %v659_v38, 0.0  ;;  %v692_v46 = vsel %vm1237_vm11, %v660_v39, 0.0  ;;  %v662_v54 = vmax.f32 %v630_v43, 0.0  ;;  %vm1280_vm2 = vmand %vm279_vm10, %vm310_vm13  ;;  %v246_v58 = vadd.s32 40, %v1147_v2  ;;  %v403_v38 = vld [vmem:[%s1157_s4 + $0x60] sm:$0xff] }
  0x41   : > { %v764_v52 = vadd.f32 %v692_v46, %v691_v45  ;;  %v664_v59 = vmax.f32 %v632_v41, 0.0  ;;  %vm283_vm3 = vcmp.ne.s32.totalorder %v261_v40, %v1152_v5  ;;  %v634_v60 = vsub.f32 %v1261_v47, %v1182_v21  ;;  %vm328_vm4 = vmand %vm280_vm12, %vm310_vm13  ;;  %v1348_v40 = vld [vmem:[%s1139_s28 + $0x58] sm:$0xff] }
  0x42   : > { %467 = vperm.xlu1 %953, %v396_v18   ;;  %462 = vperm.xlu0 %952, %v395_v19   ;;  %v693_v61 = vsel %vm1280_vm2, %v661_v53, 0.0  ;;  %vm1295_vm5 = vmand %vm328_vm4, %vm1840_vm6  ;;  %v262_v0 = vadd.s32 %v1150_v4, %v245_v49  ;;  %v695_v6 = vsel %vm1252_vm14, %v663_v51, 0.0  ;;  %v665_v7 = vmax.f32 %v633_v48, 0.0  ;;  %v406_v53 = vld [vmem:[%s1157_s4 + $0x78] sm:$0xff] }
  0x43   : > { %v765_v63 = vadd.f32 %v764_v52, %v693_v61  ;;  %vm332_vm8 = vmand %vm284_vm0, %vm312_vm1  ;;  %v694_v8 = vsel %vm1295_vm5, %v662_v54, 0.0  ;;  %v635_v9 = vsub.f32 %v1301_v1, %v1180_v20  ;;  %v1897_v11 = vmov 0  ;;  %v1370_v52 = vld [vmem:[%s1139_s28 + $0x60] sm:$0xff]  ;;  %v1388_v61 = vld [vmem:[%s1139_s28 + $0x68] sm:$0xff] }
  0x44   : > { %vm1317_vm9 = vmand %vm283_vm3, %vm312_vm1  ;;  %v696_v15 = vsel %vm1270_vm15, %v664_v59, 0.0  ;;  %v666_v16 = vmax.f32 %v634_v60, 0.0  ;;  %v263_v17 = vadd.s32 %v1150_v4, %v246_v58  ;;  %v636_v18 = vsub.f32 %v1322_v14, %v1182_v21  ;;  %v405_v58 = vld [vmem:[%s1157_s4 + $0x70] sm:$0xff] }
  0x45   : > { %v1898_v11 = vsel %vm1317_vm9, 4294967295, %v1897_v11  ;;  %v766_v12 = vadd.f32 %v765_v63, %v694_v8  ;;  %vm1331_vm10 = vmand %vm332_vm8, %vm1840_vm6  ;;  %v1899_v19 = vmov 0  ;;  %vm286_vm12 = vcmp.ne.s32.totalorder %v262_v0, %v1168_v13 }
  0x46   : > { %477 = vperm.xlu1 %953, %v398_v35   ;;  %472 = vperm.xlu0 %952, %v397_v36   ;;  %v1900_v19 = vsel %vm1331_vm10, 4294967295, %v1899_v19  ;;  %vm313_vm13 = vcmp.lt.s32.totalorder %v262_v0, 200  ;;  %v247_v29 = vadd.s32 48, %v1147_v2  ;;  %v697_v30 = vsel %vm1317_vm9, %v665_v7, 0.0  ;;  %v404_v36 = vld [vmem:[%s1157_s4 + $0x68] sm:$0xff] }
  0x47   : > { %v767_v23 = vadd.f32 %v766_v12, %v695_v6  ;;  %v637_v32 = vsub.f32 %v1336_v24, %v1180_v20  ;;  %vm285_vm0 = vcmp.ne.s32.totalorder %v262_v0, %v1152_v5  ;;  %v667_v35 = vmax.f32 %v635_v9, 0.0  ;;  %vm1357_vm1 = vmand %vm286_vm12, %vm313_vm13 }
  0x48   : > { %v698_v41 = vsel %vm1331_vm10, %v666_v16, 0.0  ;;  %v638_v42 = vsub.f32 %v1348_v40, %v1182_v21  ;;  %v668_v45 = vmax.f32 %v636_v18, 0.0  ;;  %v248_v46 = vadd.s32 56, %v1147_v2  ;;  %vm1364_vm8 = vmand %vm285_vm0, %vm313_vm13 }
  0x49   : > { %v768_v39 = vadd.f32 %v767_v23, %v696_v15  ;;  %vm288_vm3 = vcmp.ne.s32.totalorder %v263_v17, %v1168_v13  ;;  %vm314_vm4 = vcmp.lt.s32.totalorder %v263_v17, 200  ;;  %v1903_v48 = vmov 0  ;;  %vm1383_vm13 = vmand %vm1357_vm1, %vm1840_vm6 }
  0x4a   : > { %487 = vperm.xlu1 %953, %v400_v55   ;;  %482 = vperm.xlu0 %952, %v399_v56   ;;  %v1904_v48 = vsel %vm1364_vm8, 4294967295, %v1903_v48  ;;  %v264_v51 = vadd.s32 %v1150_v4, %v247_v29  ;;  %vm287_vm12 = vcmp.ne.s32.totalorder %v263_v17, %v1152_v5  ;;  %v669_v54 = vmax.f32 %v637_v32, 0.0  ;;  %vm1393_vm0 = vmand %vm288_vm3, %vm314_vm4  ;;  %v1426_v29 = vld [vmem:[%s1139_s28 + $0x78] sm:$0xff] }
  0x4b   : > { %v769_v49 = vadd.f32 %v768_v39, %v697_v30  ;;  %v699_v55 = vsel %vm1364_vm8, %v667_v35, 0.0  ;;  %v639_v56 = vsub.f32 %v1370_v52, %v1180_v20  ;;  %v1905_v59 = vmov 0  ;;  %vm1403_vm1 = vmand %vm287_vm12, %vm314_vm4 }
  0x4c   : > { %v1906_v59 = vsel %vm1383_vm13, 4294967295, %v1905_v59  ;;  %v670_v0 = vmax.f32 %v638_v42, 0.0  ;;  %v265_v6 = vadd.s32 %v1150_v4, %v248_v46  ;;  %v640_v7 = vsub.f32 %v1388_v61, %v1182_v21  ;;  %v1442_v42 = vld [vmem:[%s1139_s28 + $0x80] sm:$0xff] }
  0x4d   : > { %v770_v60 = vadd.f32 %v769_v49, %v698_v41  ;;  %v1909_v8 = vmov 0  ;;  %vm290_vm3 = vcmp.ne.s32.totalorder %v264_v51, %v1168_v13  ;;  %vm315_vm6 = vcmp.lt.s32.totalorder %v264_v51, 200 }
  0x4e   : > { %497 = vperm.xlu1 %953, %v402_v3   ;;  %492 = vperm.xlu0 %952, %v401_v10   ;;  %v700_v3 = vsel %vm1383_vm13, %v668_v45, 0.0  ;;  %v1910_v8 = vsel %vm1403_vm1, 4294967295, %v1909_v8  ;;  %v1408_v10 = vld [vmem:[%s1139_s28 + $0x70] sm:$0xff]  ;;  %v249_v12 = vadd.s32 64, %v1147_v2  ;;  %v701_v15 = vsel %vm1403_vm1, %v669_v54, 0.0  ;;  %vm338_vm1 = vmand %vm290_vm3, %vm315_vm6 }
  0x4f   : > { %v771_v9 = vadd.f32 %v770_v60, %v699_v55  ;;  %v641_v16 = vsub.f32 %v1408_v10, %v1180_v20  ;;  %vm289_vm4 = vcmp.ne.s32.totalorder %v264_v51, %v1152_v5  ;;  %v671_v17 = vmax.f32 %v639_v56, 0.0 }
  0x50   : > { %vm1911_vm12 = vcmp.lt.s32.totalorder %v1168_v13, 200  ;;  %v1912_v18 = vmov 0  ;;  %v642_v32 = vsub.f32 %v1426_v29, %v1182_v21  ;;  %v672_v35 = vmax.f32 %v640_v7, 0.0  ;;  %vm1436_vm8 = vmand %vm289_vm4, %vm315_vm6 }
  0x51   : > { %vm1421_vm13 = vmand %vm1393_vm0, %vm1911_vm12  ;;  %v772_v23 = vadd.f32 %v771_v9, %v700_v3  ;;  %vm292_vm0 = vcmp.ne.s32.totalorder %v265_v6, %v1168_v13  ;;  %vm316_vm12 = vcmp.lt.s32.totalorder %v265_v6, 200  ;;  %v1914_v39 = vmov 0  ;;  %v1474_v3 = vld [vmem:[%s1139_s28 + $0x90] sm:$0xff] }
  0x52   : > { %507 = vperm.xlu1 %953, %v404_v36   ;;  %502 = vperm.xlu0 %952, %v403_v38   ;;  %v1913_v18 = vsel %vm1421_vm13, 4294967295, %v1912_v18  ;;  %v702_v30 = vsel %vm1421_vm13, %v670_v0, 0.0  ;;  %v250_v36 = vadd.s32 72, %v1147_v2  ;;  %v1915_v39 = vsel %vm1436_vm8, 4294967295, %v1914_v39  ;;  %vm1459_vm4 = vmand %vm292_vm0, %vm316_vm12 }
  0x53   : > { %v773_v38 = vadd.f32 %v772_v23, %v701_v15  ;;  %v266_v41 = vadd.s32 %v1150_v4, %v249_v12  ;;  %vm291_vm13 = vcmp.ne.s32.totalorder %v265_v6, %v1152_v5  ;;  %v673_v43 = vmax.f32 %v641_v16, 0.0 }
  0x54   : > { %v703_v45 = vsel %vm1436_vm8, %v671_v17, 0.0  ;;  %v643_v46 = vsub.f32 %v1442_v42, %v1180_v20  ;;  %vm1916_vm3 = vcmp.lt.s32.totalorder %v1168_v13, 200  ;;  %v1917_v49 = vmov 0  ;;  %v1492_v17 = vld [vmem:[%s1139_s28 + $0x98] sm:$0xff] }
  0x55   : > { %vm1451_vm6 = vmand %vm338_vm1, %vm1916_vm3  ;;  %v774_v51 = vadd.f32 %v773_v38, %v702_v30  ;;  %v674_v55 = vmax.f32 %v642_v32, 0.0  ;;  %v1921_v63 = vmov 0  ;;  %vm294_vm0 = vcmp.ne.s32.totalorder %v266_v41, %v1168_v13 }
  0x56   : > { %517 = vperm.xlu1 %953, %v406_v53   ;;  %512 = vperm.xlu0 %952, %v405_v58   ;;  %v1918_v49 = vsel %vm1451_vm6, 4294967295, %v1917_v49  ;;  %v1456_v53 = vld [vmem:[%s1139_s28 + $0x88] sm:$0xff]  ;;  %v704_v56 = vsel %vm1451_vm6, %v672_v35, 0.0  ;;  %v267_v58 = vadd.s32 %v1150_v4, %v250_v36  ;;  %vm1469_vm1 = vmand %vm291_vm13, %vm316_vm12  ;;  %vm317_vm3 = vcmp.lt.s32.totalorder %v266_v41, 200 }
  0x57   : > { %v644_v60 = vsub.f32 %v1456_v53, %v1182_v21  ;;  %v1922_v63 = vsel %vm1469_vm1, 4294967295, %v1921_v63  ;;  %v775_v0 = vadd.f32 %v774_v51, %v703_v45  ;;  %v251_v7 = vadd.s32 80, %v1147_v2  ;;  %v1508_v45 = vld [vmem:[%s1139_s28 + $0xa0] sm:$0xff] }
  0x58   : > { %v705_v9 = vsel %vm1469_vm1, %v673_v43, 0.0  ;;  %v645_v12 = vsub.f32 %v1474_v3, %v1180_v20  ;;  %vm293_vm13 = vcmp.ne.s32.totalorder %v266_v41, %v1152_v5  ;;  %v675_v6 = vmax.f32 %v643_v46, 0.0  ;;  %vm342_vm1 = vmand %vm294_vm0, %vm317_vm3 }
  0x59   : > { %vm1923_vm12 = vcmp.lt.s32.totalorder %v1168_v13, 200  ;;  %v1924_v15 = vmov 0  ;;  %v776_v16 = vadd.f32 %v775_v0, %v704_v56  ;;  %v646_v30 = vsub.f32 %v1492_v17, %v1182_v21  ;;  %vm1502_vm8 = vmand %vm293_vm13, %vm317_vm3  ;;  %v1522_v56 = vld [vmem:[%s1139_s28 + $0xa8] sm:$0xff] }
  0x5a   : > { %vm1487_vm6 = vmand %vm1459_vm4, %vm1923_vm12  ;;  %v676_v32 = vmax.f32 %v644_v60, 0.0  ;;  %v252_v35 = vadd.s32 88, %v1147_v2  ;;  %vm296_vm4 = vcmp.ne.s32.totalorder %v267_v58, %v1168_v13  ;;  %vm318_vm12 = vcmp.lt.s32.totalorder %v267_v58, 200  ;;  %1931 = vst [vmem:[#allocation8_spill] sm:$0xff] %v1522_v56 }
  0x5b   : > { %v1925_v15 = vsel %vm1487_vm6, 4294967295, %v1924_v15  ;;  %v706_v23 = vsel %vm1487_vm6, %v674_v55, 0.0  ;;  %v777_v36 = vadd.f32 %v776_v16, %v705_v9  ;;  %v1926_v38 = vmov 0  ;;  %vm1525_vm13 = vmand %vm296_vm4, %vm318_vm12 }
  0x5c   : > { %v1927_v38 = vsel %vm1502_vm8, 4294967295, %v1926_v38  ;;  %v268_v43 = vadd.s32 %v1150_v4, %v251_v7  ;;  %vm295_vm6 = vcmp.ne.s32.totalorder %v267_v58, %v1152_v5  ;;  %v677_v46 = vmax.f32 %v645_v12, 0.0 }
  0x5d   : > { %v707_v51 = vsel %vm1502_vm8, %v675_v6, 0.0  ;;  %v647_v54 = vsub.f32 %v1508_v45, %v1180_v20  ;;  %vm1928_vm0 = vcmp.lt.s32.totalorder %v1168_v13, 200  ;;  %v1929_v41 = vmov 0 }
  0x5e   : > { %vm1517_vm3 = vmand %vm342_vm1, %vm1928_vm0  ;;  %v778_v55 = vadd.f32 %v777_v36, %v706_v23  ;;  %v678_v0 = vmax.f32 %v646_v30, 0.0  ;;  %v269_v9 = vadd.s32 %v1150_v4, %v252_v35  ;;  %v648_v12 = vsub.f32 %v1522_v56, %v1182_v21  ;;  %v1540_v23 = vld [vmem:[%s1139_s28 + $0xb0] sm:$0xff] }
  0x5f   : > { %v1930_v41 = vsel %vm1517_vm3, 4294967295, %v1929_v41  ;;  %v708_v7 = vsel %vm1517_vm3, %v676_v32, 0.0  ;;  %vm1535_vm1 = vmand %vm295_vm6, %vm318_vm12  ;;  %v1934_v6 = vmov 0  ;;  %1937 = vst [vmem:[#allocation10_spill] sm:$0xff] %v1540_v23  ;;  %vm298_vm4 = vcmp.ne.s32.totalorder %v268_v43, %v1168_v13  ;;  %v1606_v56 = vld [vmem:[%s1139_s28 + $0xd0] sm:$0xff] }
  0x60   : > { %v1935_v6 = vsel %vm1535_vm1, 4294967295, %v1934_v6  ;;  %v779_v16 = vadd.f32 %v778_v55, %v707_v51  ;;  %vm319_vm0 = vcmp.lt.s32.totalorder %v268_v43, 200  ;;  %v253_v30 = vadd.s32 96, %v1147_v2  ;;  %v1558_v55 = vld [vmem:[%s1139_s28 + $0xb8] sm:$0xff]  ;;  %1956 = vst [vmem:[#allocation17_spill] sm:$0xff] %v1606_v56 }
  0x61   : > { %1936 = vst [vmem:[#allocation9_spill] sm:$0xff] %v1935_v6  ;;  %v709_v32 = vsel %vm1535_vm1, %v677_v46, 0.0  ;;  %v649_v35 = vsub.f32 %v1540_v23, %v1180_v20  ;;  %vm297_vm6 = vcmp.ne.s32.totalorder %v268_v43, %v1152_v5  ;;  %v679_v58 = vmax.f32 %v647_v54, 0.0  ;;  %1942 = vst [vmem:[#allocation12_spill] sm:$0xff] %v1558_v55 }
  0x62   : > { %vm1938_vm12 = vcmp.lt.s32.totalorder %v1168_v13, 200  ;;  %v1939_v36 = vmov 0  ;;  %v780_v51 = vadd.f32 %v779_v16, %v708_v7  ;;  %v650_v23 = vsub.f32 %v1558_v55, %v1182_v21  ;;  %vm346_vm1 = vmand %vm298_vm4, %vm319_vm0  ;;  %v1574_v16 = vld [vmem:[%s1139_s28 + $0xc0] sm:$0xff] }
  0x63   : > { %vm1553_vm3 = vmand %vm1525_vm13, %vm1938_vm12  ;;  %v680_v54 = vmax.f32 %v648_v12, 0.0  ;;  %v254_v6 = vadd.s32 104, %v1147_v2  ;;  %vm300_vm13 = vcmp.ne.s32.totalorder %v269_v9, %v1168_v13  ;;  %vm320_vm12 = vcmp.lt.s32.totalorder %v269_v9, 200  ;;  %1946 = vst [vmem:[#allocation14_spill] sm:$0xff] %v1574_v16 }
  0x64   : > { %v1940_v36 = vsel %vm1553_vm3, 4294967295, %v1939_v36  ;;  %v710_v46 = vsel %vm1553_vm3, %v678_v0, 0.0  ;;  %v781_v60 = vadd.f32 %v780_v51, %v709_v32  ;;  %vm1568_vm8 = vmand %vm297_vm6, %vm319_vm0  ;;  %v1943_v7 = vmov 0 }
  0x65   : > { %1941 = vst [vmem:[#allocation11_spill] sm:$0xff] %v1940_v36  ;;  %v1944_v7 = vsel %vm1568_vm8, 4294967295, %v1943_v7  ;;  %v270_v0 = vadd.s32 %v1150_v4, %v253_v30  ;;  %vm299_vm3 = vcmp.ne.s32.totalorder %v269_v9, %v1152_v5  ;;  %v681_v55 = vmax.f32 %v649_v35, 0.0  ;;  %v1588_v30 = vld [vmem:[%s1139_s28 + $0xc8] sm:$0xff]  ;;  %vm1591_vm6 = vmand %vm300_vm13, %vm320_vm12 }
  0x66   : > { %1945 = vst [vmem:[#allocation13_spill] sm:$0xff] %v1944_v7  ;;  %v711_v12 = vsel %vm1568_vm8, %v679_v58, 0.0  ;;  %v651_v32 = vsub.f32 %v1574_v16, %v1180_v20  ;;  %vm1947_vm4 = vcmp.lt.s32.totalorder %v1168_v13, 200  ;;  %v1948_v43 = vmov 0  ;;  %1950 = vst [vmem:[#allocation15_spill] sm:$0xff] %v1588_v30 }
  0x67   : > { %vm1583_vm0 = vmand %vm346_vm1, %vm1947_vm4  ;;  %v782_v51 = vadd.f32 %v781_v60, %v710_v46  ;;  %v682_v35 = vmax.f32 %v650_v23, 0.0  ;;  %v271_v16 = vadd.s32 %v1150_v4, %v254_v6  ;;  %v652_v7 = vsub.f32 %v1588_v30, %v1182_v21  ;;  %v1624_v30 = vld [vmem:[%s1139_s28 + $0xd8] sm:$0xff] }
  0x68   : > { %v1949_v43 = vsel %vm1583_vm0, 4294967295, %v1948_v43  ;;  %v712_v58 = vsel %vm1583_vm0, %v680_v54, 0.0  ;;  %vm1601_vm1 = vmand %vm299_vm3, %vm320_vm12  ;;  %v1953_v46 = vmov 0  ;;  %vm302_vm13 = vcmp.ne.s32.totalorder %v270_v0, %v1168_v13  ;;  %1960 = vst [vmem:[#allocation18_spill] sm:$0xff] %v1624_v30 }
  0x69   : > { %v1954_v46 = vsel %vm1601_vm1, 4294967295, %v1953_v46  ;;  %v783_v60 = vadd.f32 %v782_v51, %v711_v12  ;;  %vm321_vm4 = vcmp.lt.s32.totalorder %v270_v0, 200  ;;  %v255_v23 = vadd.s32 112, %v1147_v2 }
  0x6a   : > { %1955 = vst [vmem:[#allocation16_spill] sm:$0xff] %v1954_v46  ;;  %v713_v54 = vsel %vm1601_vm1, %v681_v55, 0.0  ;;  %v653_v6 = vsub.f32 %v1606_v56, %v1180_v20  ;;  %vm301_vm3 = vcmp.ne.s32.totalorder %v270_v0, %v1152_v5  ;;  %v683_v9 = vmax.f32 %v651_v32, 0.0  ;;  %vm350_vm1 = vmand %vm302_vm13, %vm321_vm4 }
  0x6b   : > { %vm1957_vm12 = vcmp.lt.s32.totalorder %v1168_v13, 200  ;;  %v1958_v12 = vmov 0  ;;  %v784_v51 = vadd.f32 %v783_v60, %v712_v58  ;;  %v654_v56 = vsub.f32 %v1624_v30, %v1182_v21  ;;  %vm1634_vm8 = vmand %vm301_vm3, %vm321_vm4  ;;  %v1640_v60 = vld [vmem:[%s1139_s28 + $0xe0] sm:$0xff] }
  0x6c   : > { %vm1619_vm0 = vmand %vm1591_vm6, %vm1957_vm12  ;;  %v684_v32 = vmax.f32 %v652_v7, 0.0  ;;  %v256_v46 = vadd.s32 120, %v1147_v2  ;;  %vm304_vm6 = vcmp.ne.s32.totalorder %v271_v16, %v1168_v13  ;;  %vm322_vm12 = vcmp.lt.s32.totalorder %v271_v16, 200  ;;  %1964 = vst [vmem:[#allocation20_spill] sm:$0xff] %v1640_v60 }
  0x6d   : > { %v1959_v12 = vsel %vm1619_vm0, 4294967295, %v1958_v12  ;;  %v714_v55 = vsel %vm1619_vm0, %v682_v35, 0.0  ;;  %v785_v36 = vadd.f32 %v784_v51, %v713_v54  ;;  %v1961_v58 = vmov 0  ;;  %vm352_vm3 = vmand %vm304_vm6, %vm322_vm12 }
  0x6e   : > { %v1962_v58 = vsel %vm1634_vm8, 4294967295, %v1961_v58  ;;  %v272_v35 = vadd.s32 %v1150_v4, %v255_v23  ;;  %vm303_vm0 = vcmp.ne.s32.totalorder %v271_v16, %v1152_v5  ;;  %v685_v30 = vmax.f32 %v653_v6, 0.0  ;;  %v1654_v23 = vld [vmem:[%s1139_s28 + $0xe8] sm:$0xff] }
  0x6f   : > { %1963 = vst [vmem:[#allocation19_spill] sm:$0xff] %v1962_v58  ;;  %v715_v2 = vsel %vm1634_vm8, %v683_v9, 0.0  ;;  %v655_v7 = vsub.f32 %v1640_v60, %v1180_v20  ;;  %vm1965_vm13 = vcmp.lt.s32.totalorder %v1168_v13, 200  ;;  %v1966_v0 = vmov 0  ;;  %vm1662_vm8 = vmand %vm303_vm0, %vm322_vm12 }
  0x70   : > { %vm1649_vm4 = vmand %vm350_vm1, %vm1965_vm13  ;;  %v786_v54 = vadd.f32 %v785_v36, %v714_v55  ;;  %v686_v51 = vmax.f32 %v654_v56, 0.0  ;;  %v656_v9 = vsub.f32 %v1654_v23, %v1182_v21  ;;  %v1968_v60 = vmov 0  ;;  %v1668_v36 = vld [vmem:[%s1139_s28 + $0xf0] sm:$0xff] }
  0x71   : > { %v1967_v0 = vsel %vm1649_vm4, 4294967295, %v1966_v0  ;;  %v716_v6 = vsel %vm1649_vm4, %v684_v32, 0.0  ;;  %v1969_v60 = vsel %vm1662_vm8, 4294967295, %v1968_v60  ;;  %v273_v55 = vadd.s32 %v1150_v4, %v256_v46  ;;  %1970 = vst [vmem:[#allocation21_spill] sm:$0xff] %v1668_v36  ;;  %v1683_v46 = vld [vmem:[%s1139_s28 + $0xf8] sm:$0xff] }
  0x72   : > { %v787_v58 = vadd.f32 %v786_v54, %v715_v2  ;;  %vm306_vm1 = vcmp.ne.s32.totalorder %v272_v35, %v1168_v13  ;;  %vm323_vm6 = vcmp.lt.s32.totalorder %v272_v35, 200  ;;  %v717_v56 = vsel %vm1662_vm8, %v685_v30, 0.0 }
  0x73   : > { %v657_v32 = vsub.f32 %v1668_v36, %v1180_v20  ;;  %vm305_vm13 = vcmp.ne.s32.totalorder %v272_v35, %v1152_v5  ;;  %v687_v16 = vmax.f32 %v655_v7, 0.0  ;;  %vm1971_vm0 = vcmp.lt.s32.totalorder %v1168_v13, 200  ;;  %vm354_vm8 = vmand %vm306_vm1, %vm323_vm6 }
  0x74   : > { %vm1678_vm12 = vmand %vm352_vm3, %vm1971_vm0  ;;  %v1972_v2 = vmov 0  ;;  %v788_v4 = vadd.f32 %v787_v58, %v716_v6  ;;  %v658_v30 = vsub.f32 %v1683_v46, %v1182_v21  ;;  %v688_v20 = vmax.f32 %v656_v9, 0.0 }
  0x75   : > { %v1973_v2 = vsel %vm1678_vm12, 4294967295, %v1972_v2  ;;  %v718_v54 = vsel %vm1678_vm12, %v686_v51, 0.0  ;;  %vm324_vm4 = vcmp.lt.s32.totalorder %v273_v55, 200  ;;  %vm1689_vm10 = vmand %vm305_vm13, %vm323_vm6  ;;  %vm308_vm3 = vcmp.ne.s32.totalorder %v273_v55, %v1168_v13 }
  0x76   : > { %v789_v36 = vadd.f32 %v788_v4, %v717_v56  ;;  %vm307_vm0 = vcmp.ne.s32.totalorder %v273_v55, %v1152_v5  ;;  %v689_v58 = vmax.f32 %v657_v32, 0.0  ;;  %v719_v7 = vsel %vm1689_vm10, %v687_v16, 0.0  ;;  %vm356_vm1 = vmand %vm308_vm3, %vm324_vm4 }
  0x77   : > { %vm1976_vm12 = vcmp.lt.s32.totalorder %v1168_v13, 200  ;;  %v1977_v21 = vmov 0  ;;  %v690_v6 = vmax.f32 %v658_v30, 0.0  ;;  %vm1705_vm6 = vmand %vm307_vm0, %vm324_vm4  ;;  %v1980_v56 = vmov 0 }
  0x78   : > { %vm1699_vm9 = vmand %vm354_vm8, %vm1976_vm12  ;;  %v790_v51 = vadd.f32 %v789_v36, %v718_v54  ;;  %v1981_v56 = vsel %vm1705_vm6, 4294967295, %v1980_v56  ;;  %v721_v55 = vsel %vm1705_vm6, %v689_v58, 0.0  ;;  %vm1992_vm4 = vnez %v1915_v39 }
  0x79   : > { %v1978_v21 = vsel %vm1699_vm9, 4294967295, %v1977_v21  ;;  %v720_v9 = vsel %vm1699_vm9, %v688_v20, 0.0  ;;  %1982 = vst [vmem:[#allocation23_spill] sm:$0xff] %v1981_v56  ;;  %vm1983_vm13 = vmmov %vm1976_vm12  ;;  %vm1993_vm12 = vnez %v1918_v49  ;;  %vm1994_vm3 = vnez %v1922_v63 }
  0x7a   : > { %1979 = vst [vmem:[#allocation22_spill] sm:$0xff] %v1978_v21  ;;  %v791_v5 = vadd.f32 %v790_v51, %v719_v7  ;;  %vm1713_vm8 = vmand %vm356_vm1, %vm1983_vm13  ;;  %vm1995_vm0 = vnez %v1925_v15  ;;  %vm1996_vm1 = vnez %v1927_v38  ;;  %vm1997_vm13 = vnez %v1930_v41 }
  0x7b   : > { %v722_v16 = vsel %vm1713_vm8, %v690_v6, 0.0 }
  0x7c   : > { %v792_v36 = vadd.f32 %v791_v5, %v720_v9 }
  0x7e   : > { %v793_v4 = vadd.f32 %v792_v36, %v721_v55 }
  0x80   : > { %v794_v54 = vadd.f32 %v793_v4, %v722_v16 }
  0x82   : > { %795 = vadd.xlane.f32.xlu1 %v794_v54 }
  0xb5   : > { %v443_v30 = vpop.permute.xlu0 %442  ;;  %v453_v51 = vpop.permute.xlu1 %452 }
  0xb6   : > { %v520_v20 = vsub.f32 %v1198_v25, %v443_v30  ;;  %v521_v7 = vsub.f32 %v1201_v26, %v443_v30  ;;  %v524_v13 = vsub.f32 %v1185_v22, %v453_v51  ;;  %v525_v25 = vsub.f32 %v1204_v27, %v453_v51 }
  0xb8   : > { %v552_v58 = vmax.f32 %v520_v20, 0.0  ;;  %v553_v56 = vmax.f32 %v521_v7, 0.0  ;;  %v556_v36 = vmax.f32 %v524_v13, 0.0  ;;  %v557_v37 = vmax.f32 %v525_v25, 0.0 }
  0xb9   : > { %v448_v21 = vpop.permute.xlu0 %447  ;;  %v458_v4 = vpop.permute.xlu1 %457 }
  0xba   : > { %v584_v9 = vsel %vm1209_vm7, %v552_v58, 0.0  ;;  %v585_v6 = vsel %vm1237_vm11, %v553_v56, 0.0  ;;  %v522_v5 = vsub.f32 %v1228_v33, %v448_v21  ;;  %v523_v55 = vsub.f32 %v1231_v34, %v448_v21 }
  0xbb   : > { %v724_v16 = vadd.f32 %v585_v6, %v584_v9  ;;  %v526_v22 = vsub.f32 %v1218_v31, %v458_v4  ;;  %v588_v33 = vsel %vm1252_vm14, %v556_v36, 0.0  ;;  %v527_v34 = vsub.f32 %v1261_v47, %v458_v4 }
  0xbc   : > { %v554_v26 = vmax.f32 %v522_v5, 0.0  ;;  %v555_v54 = vmax.f32 %v523_v55, 0.0  ;;  %v589_v57 = vsel %vm1270_vm15, %v557_v37, 0.0  ;;  %vm1986_vm7 = vnez %v1898_v11 }
  0xbd   : > { %v463_v20 = vpop.permute.xlu0 %462  ;;  %v558_v56 = vmax.f32 %v526_v22, 0.0  ;;  %v468_v31 = vpop.permute.xlu1 %467  ;;  %v559_v58 = vmax.f32 %v527_v34, 0.0  ;;  %vm1987_vm11 = vnez %v1900_v19  ;;  %vm1988_vm14 = vnez %v1904_v48 }
  0xbe   : > { %v586_v28 = vsel %vm1280_vm2, %v554_v26, 0.0  ;;  %v587_v27 = vsel %vm1295_vm5, %v555_v54, 0.0  ;;  %v528_v7 = vsub.f32 %v1301_v1, %v463_v20  ;;  %v529_v13 = vsub.f32 %v1322_v14, %v463_v20 }
  0xbf   : > { %v725_v30 = vadd.f32 %v724_v16, %v586_v28  ;;  %v590_v44 = vsel %vm1986_vm7, %v558_v56, 0.0  ;;  %v530_v47 = vsub.f32 %v1336_v24, %v468_v31  ;;  %v591_v1 = vsel %vm1987_vm11, %v559_v58, 0.0 }
  0xc0   : > { %v560_v62 = vmax.f32 %v528_v7, 0.0  ;;  %v531_v55 = vsub.f32 %v1348_v40, %v468_v31  ;;  %v561_v25 = vmax.f32 %v529_v13, 0.0  ;;  %vm1989_vm15 = vnez %v1906_v59 }
  0xc1   : > { %v726_v21 = vadd.f32 %v725_v30, %v587_v27  ;;  %v473_v5 = vpop.permute.xlu0 %472  ;;  %v562_v36 = vmax.f32 %v530_v47, 0.0  ;;  %v478_v16 = vpop.permute.xlu1 %477  ;;  %vm1990_vm2 = vnez %v1910_v8  ;;  %vm1991_vm5 = vnez %v1913_v18 }
  0xc2   : > { %v592_v14 = vsel %vm1988_vm14, %v560_v62, 0.0  ;;  %v532_v26 = vsub.f32 %v1370_v52, %v473_v5  ;;  %v563_v4 = vmax.f32 %v531_v55, 0.0  ;;  %v593_v24 = vsel %vm1989_vm15, %v561_v25, 0.0  ;;  %v1998_v62 = vld [vmem:[#allocation8_spill] sm:$0xff] }
  0xc3   : > { %v727_v51 = vadd.f32 %v726_v21, %v588_v33  ;;  %v533_v54 = vsub.f32 %v1388_v61, %v473_v5  ;;  %v594_v40 = vsel %vm1990_vm2, %v562_v36, 0.0  ;;  %v534_v22 = vsub.f32 %v1408_v10, %v478_v16  ;;  %v1999_v5 = vld [vmem:[#allocation9_spill] sm:$0xff]  ;;  %v2002_v36 = vld [vmem:[#allocation11_spill] sm:$0xff] }
  0xc4   : > { %v564_v28 = vmax.f32 %v532_v26, 0.0  ;;  %v595_v52 = vsel %vm1991_vm5, %v563_v4, 0.0  ;;  %v535_v20 = vsub.f32 %v1426_v29, %v478_v16  ;;  %vm2000_vm7 = vnez %v1999_v5  ;;  %v2005_v4 = vld [vmem:[#allocation13_spill] sm:$0xff] }
  0xc5   : > { %v728_v9 = vadd.f32 %v727_v51, %v589_v57  ;;  %v483_v48 = vpop.permute.xlu0 %482  ;;  %v565_v37 = vmax.f32 %v533_v54, 0.0  ;;  %v566_v59 = vmax.f32 %v534_v22, 0.0  ;;  %v488_v27 = vpop.permute.xlu1 %487  ;;  %vm2003_vm11 = vnez %v2002_v36  ;;  %v2007_v54 = vld [vmem:[#allocation14_spill] sm:$0xff] }
  0xc6   : > { %v596_v61 = vsel %vm1992_vm4, %v564_v28, 0.0  ;;  %v536_v34 = vsub.f32 %v1442_v42, %v483_v48  ;;  %v567_v21 = vmax.f32 %v535_v20, 0.0  ;;  %v537_v56 = vsub.f32 %v1456_v53, %v483_v48  ;;  %v2009_v48 = vld [vmem:[#allocation15_spill] sm:$0xff] }
  0xc7   : > { %v729_v6 = vadd.f32 %v728_v9, %v590_v44  ;;  %v597_v10 = vsel %vm1993_vm12, %v565_v37, 0.0  ;;  %v598_v29 = vsel %vm1994_vm3, %v566_v59, 0.0  ;;  %v538_v7 = vsub.f32 %v1474_v3, %v488_v27  ;;  %v2010_v37 = vld [vmem:[#allocation16_spill] sm:$0xff]  ;;  %v2012_v59 = vld [vmem:[#allocation17_spill] sm:$0xff] }
  0xc8   : > { %v568_v51 = vmax.f32 %v536_v34, 0.0  ;;  %v599_v42 = vsel %vm1995_vm0, %v567_v21, 0.0  ;;  %v539_v57 = vsub.f32 %v1492_v17, %v488_v27  ;;  %v569_v58 = vmax.f32 %v537_v56, 0.0 }
  0xc9   : > { %v730_v50 = vadd.f32 %v729_v6, %v591_v1  ;;  %v493_v39 = vpop.permute.xlu0 %492  ;;  %v570_v49 = vmax.f32 %v538_v7, 0.0  ;;  %v498_v44 = vpop.permute.xlu1 %497  ;;  %v2001_v1 = vld [vmem:[#allocation10_spill] sm:$0xff]  ;;  %vm2006_vm14 = vnez %v2005_v4  ;;  %vm2008_vm15 = vnez %v1949_v43  ;;  %v2015_v7 = vld [vmem:[#allocation19_spill] sm:$0xff] }
  0xca   : > { %v600_v53 = vsel %vm1996_vm1, %v568_v51, 0.0  ;;  %v540_v9 = vsub.f32 %v1508_v45, %v493_v39  ;;  %v571_v47 = vmax.f32 %v539_v57, 0.0  ;;  %v601_v3 = vsel %vm1997_vm13, %v569_v58, 0.0 }
  0xcb   : > { %v731_v11 = vadd.f32 %v730_v50, %v592_v14  ;;  %v541_v6 = vsub.f32 %v1998_v62, %v493_v39  ;;  %v602_v17 = vsel %vm2000_vm7, %v570_v49, 0.0  ;;  %v542_v55 = vsub.f32 %v2001_v1, %v498_v44  ;;  %v2004_v14 = vld [vmem:[#allocation12_spill] sm:$0xff] }
  0xcc   : > { %v572_v25 = vmax.f32 %v540_v9, 0.0  ;;  %v603_v45 = vsel %vm2003_vm11, %v571_v47, 0.0  ;;  %v543_v26 = vsub.f32 %v2004_v14, %v498_v44  ;;  %vm2011_vm2 = vnez %v2010_v37  ;;  %v2020_v9 = vld [vmem:[#allocation21_spill] sm:$0xff] }
  0xcd   : > { %v732_v19 = vadd.f32 %v731_v11, %v593_v24  ;;  %v503_v38 = vpop.permute.xlu0 %502  ;;  %v573_v11 = vmax.f32 %v541_v6, 0.0  ;;  %v574_v41 = vmax.f32 %v542_v55, 0.0  ;;  %v508_v22 = vpop.permute.xlu1 %507  ;;  %vm2013_vm5 = vnez %v1959_v12 }
  0xce   : > { %v604_v24 = vsel %vm2006_vm14, %v572_v25, 0.0  ;;  %v575_v28 = vmax.f32 %v543_v26, 0.0  ;;  %vm2016_vm4 = vnez %v2015_v7  ;;  %vm2018_vm12 = vnez %v1967_v0 }
  0xcf   : > { %v733_v30 = vadd.f32 %v732_v19, %v594_v40  ;;  %v544_v19 = vsub.f32 %v2007_v54, %v503_v38  ;;  %vm2019_vm3 = vnez %v1969_v60  ;;  %vm2021_vm0 = vnez %v1973_v2 }
  0xd0   : > { %v607_v21 = vsel %vm2013_vm5, %v575_v28, 0.0 }
  0xd1   : > { %v734_v33 = vadd.f32 %v733_v30, %v595_v52  ;;  %v605_v30 = vsel %vm2008_vm15, %v573_v11, 0.0  ;;  %v545_v52 = vsub.f32 %v2009_v48, %v503_v38  ;;  %v576_v34 = vmax.f32 %v544_v19, 0.0  ;;  %v513_v27 = vpop.permute.xlu0 %512  ;;  %v518_v57 = vpop.permute.xlu1 %517 }
  0xd2   : > { %v549_v49 = vsub.f32 %v1654_v23, %v513_v27  ;;  %v551_v62 = vsub.f32 %v1683_v46, %v518_v57 }
  0xd3   : > { %v735_v8 = vadd.f32 %v734_v33, %v596_v61  ;;  %v606_v33 = vsel %vm2011_vm2, %v574_v41, 0.0  ;;  %v546_v61 = vsub.f32 %v2012_v59, %v508_v22  ;;  %v608_v51 = vsel %vm2016_vm4, %v576_v34, 0.0 }
  0xd4   : > { %v581_v6 = vmax.f32 %v549_v49, 0.0 }
  0xd5   : > { %v736_v18 = vadd.f32 %v735_v8, %v597_v10  ;;  %v2014_v10 = vld [vmem:[#allocation18_spill] sm:$0xff]  ;;  %v578_v43 = vmax.f32 %v546_v61, 0.0 }
  0xd6   : > { %v547_v56 = vsub.f32 %v2014_v10, %v508_v22  ;;  %v613_v1 = vsel %vm1699_vm9, %v581_v6, 0.0 }
  0xd7   : > { %v737_v31 = vadd.f32 %v736_v18, %v598_v29  ;;  %v577_v18 = vmax.f32 %v545_v52, 0.0 }
  0xd8   : > { %v579_v58 = vmax.f32 %v547_v56, 0.0 }
  0xd9   : > { %v738_v13 = vadd.f32 %v737_v31, %v599_v42  ;;  %v2017_v31 = vld [vmem:[#allocation20_spill] sm:$0xff] }
  0xda   : > { %v548_v39 = vsub.f32 %v2017_v31, %v513_v27 }
  0xdb   : > { %v739_v63 = vadd.f32 %v738_v13, %v600_v53  ;;  %v609_v13 = vsel %vm2018_vm12, %v577_v18, 0.0  ;;  %v610_v53 = vsel %vm2019_vm3, %v578_v43, 0.0 }
  0xdc   : > { %v580_v44 = vmax.f32 %v548_v39, 0.0 }
  0xdd   : > { %v740_v15 = vadd.f32 %v739_v63, %v601_v3  ;;  %v550_v63 = vsub.f32 %v2020_v9, %v518_v57  ;;  %v611_v3 = vsel %vm2021_vm0, %v579_v58, 0.0 }
  0xde   : > { %v612_v23 = vsel %vm1689_vm10, %v580_v44, 0.0 }
  0xdf   : > { %v741_v50 = vadd.f32 %v740_v15, %v602_v17  ;;  %v582_v0 = vmax.f32 %v550_v63, 0.0  ;;  %v583_v17 = vmax.f32 %v551_v62, 0.0 }
  0xe1   : > { %v742_v16 = vadd.f32 %v741_v50, %v603_v45  ;;  %v614_v50 = vsel %vm1705_vm6, %v582_v0, 0.0  ;;  %v615_v38 = vsel %vm1713_vm8, %v583_v17, 0.0 }
  0xe3   : > { %v743_v40 = vadd.f32 %v742_v16, %v604_v24 }
  0xe5   : > { %v744_v20 = vadd.f32 %v743_v40, %v605_v30 }
  0xe7   : > { %v745_v8 = vadd.f32 %v744_v20, %v606_v33 }
  0xe9   : > { %v746_v29 = vadd.f32 %v745_v8, %v607_v21 }
  0xeb   : > { %v747_v42 = vadd.f32 %v746_v29, %v608_v51 }
  0xed   : > { %v748_v12 = vadd.f32 %v747_v42, %v609_v13 }
  0xef   : > { %v749_v47 = vadd.f32 %v748_v12, %v610_v53 }
  0xf1   : > { %v750_v15 = vadd.f32 %v749_v47, %v611_v3 }
  0xf3   : > { %v751_v5 = vadd.f32 %v750_v15, %v612_v23 }
  0xf5   : > { %v752_v55 = vadd.f32 %v751_v5, %v613_v1 }
  0xf7   : > { %v753_v2 = vadd.f32 %v752_v55, %v614_v50 }
  0xf9   : > { %v754_v46 = vadd.f32 %v753_v2, %v615_v38 }
  0xfb   : > { %755 = vadd.xlane.f32.xlu0 %v754_v46 }
 0x10b   : > { %v796_v35 = vpop.xlane.xlu1 %795 }
 0x10c   : > { %v797_v36 = vrot.slane %v796_v35, 4 }
 0x10e   : > { %v798_v45 = vadd.f32 %v797_v36, %v796_v35 }
 0x110   : > { %v799_v14 = vrot.slane %v798_v45, 2 }
 0x112   : > { %v800_v41 = vadd.f32 %v799_v14, %v798_v45 }
 0x114   : > { %v801_v54 = vrot.slane %v800_v41, 1 }
 0x116   : > { %v802_v40 = vadd.f32 %v801_v54, %v800_v41 }
 0x184   : > { %v756_v26 = vpop.xlane.xlu0 %755 }
 0x185   : > { %v757_v11 = vrot.slane %v756_v26, 4 }
 0x187   : > { %v758_v16 = vadd.f32 %v757_v11, %v756_v26 }
 0x189   : > { %v759_v4 = vrot.slane %v758_v16, 2 }
 0x18b   : > { %v760_v24 = vadd.f32 %v759_v4, %v758_v16 }
 0x18d   : > { %v761_v19 = vrot.slane %v760_v24, 1 }
 0x18f   : > { %v762_v32 = vadd.f32 %v761_v19, %v760_v24 }
 0x191   : > { %895 = vpush %v762_v32 }
 0x192   : > { %897 = vpush %v802_v40 }
 0x1c2   : > { %s896_s9 = spop %895 }
 0x1c3   : > { %s898_s10 = spop %897 }
 0x1c4   : > { %s804_s11 = sadd.f32 %s898_s10, %s896_s9 }
 0x1c6   : > { %s805_s12 = sadd.f32 %s804_s11, %s723_s8 }
 0x1c8   : > { %807 = sst [smem:[#allocation5]] %s805_s12 }
 0x1c9   : > { %904 = dma.smem_to_hbm (%p913_p9), %s1037_s18, 16, %s1837_s3, [#allocation4]  }
 0x1ca   : > { %1013 = dma.done.wait (%p913_p9), [#allocation4], 16  }
 0x1cb   : > { %1015 = vsyncadd (%p913_p9), [#allocation4], 4294967280 }
 0x1cc   : > { %821 = sfence }
 0x1cd PF: > { %p14_p1 = scmp.ge.s32.totalorder %s1080_s17, 4   ;;  %s2025_s12 = smov %s1022_s13 }
 0x1ce   : > { %s2026_s13 = smov %s1026_s14  ;;  %s2027_s14 = smov %s1090_s20 }
 0x1cf   : > { %s2028_s15 = smov %s1080_s17  ;;  %16 = sbr.rel (!%p14_p1) target bundleno = 4 (0x4), region = 78 }
 0x1d4   :  { %827 = vsyncpa [#allocation3], 1 }
 0x1d5   :  { %829 = vsyncpa [#allocation3 + $0x1], 1 }
 0x1d6   :  { %830 = vsyncpa [#allocation4], 1 }
 0x1d7   :  { %832 = vsyncpa [#allocation4 + $0x1], 1 }

</bundles_post_ra>
